<compile_context>
chip_gen: v5e
topology: v5e:2x2
jax: 0.10.0
libtpu: 0.0.40
codegen_flags: <defaults>
</compile_context>

<pallas_src>
import functools

import jax
import jax.numpy as jnp
from jax.experimental import pallas as pl
from jax.experimental.pallas import tpu as pltpu

LANE = 128


def _round_up(x, m):
    return ((x + m - 1) // m) * m


# ----------------------------------------------------------------------------------
# Fused conv matmul kernel: (patches @ weights) + bias -> (pre-ReLU, ReLU) outputs
# ----------------------------------------------------------------------------------

def _matmul_bias_relu_kernel(a_ref, b_ref, bias_ref, pre_ref, post_ref, acc_ref):
    @pl.when(pl.program_id(2) == 0)
    def _init():
        acc_ref[...] = jnp.zeros_like(acc_ref)

    acc_ref[...] += jnp.dot(a_ref[...], b_ref[...],
                            preferred_element_type=jnp.float32)

    @pl.when(pl.program_id(2) == pl.num_programs(2) - 1)
    def _fin():
        res = acc_ref[...] + bias_ref[...]
        pre_ref[...] = res
        post_ref[...] = jnp.maximum(res, 0.0)


def pallas_matmul_bias_relu(a, b, bias):
    """a: (M, K), b: (K, N), bias: (N,) -> (pre, post), each (Mp, Np) f32 (lane-dense)."""
    M, K = a.shape
    _, Nn = b.shape
    tm = min(512, _round_up(M, 128))
    tk = min(512, _round_up(K, 128))
    tn = min(256, _round_up(Nn, 128))
    Mp, Kp, Np = _round_up(M, tm), _round_up(K, tk), _round_up(Nn, tn)

    a_p = jnp.pad(a.astype(jnp.float32), ((0, Mp - M), (0, Kp - K))).astype(jnp.bfloat16)
    b_p = jnp.pad(b.astype(jnp.float32), ((0, Kp - K), (0, Np - Nn))).astype(jnp.bfloat16)
    bias_p = jnp.pad(bias.astype(jnp.float32), (0, Np - Nn)).reshape(1, Np)

    grid = (Mp // tm, Np // tn, Kp // tk)
    pre, post = pl.pallas_call(
        _matmul_bias_relu_kernel,
        out_shape=(jax.ShapeDtypeStruct((Mp, Np), jnp.float32),
                   jax.ShapeDtypeStruct((Mp, Np), jnp.float32)),
        grid=grid,
        in_specs=[
            pl.BlockSpec((tm, tk), lambda i, j, k: (i, k)),
            pl.BlockSpec((tk, tn), lambda i, j, k: (k, j)),
            pl.BlockSpec((1, tn), lambda i, j, k: (0, j)),
        ],
        out_specs=(
            pl.BlockSpec((tm, tn), lambda i, j, k: (i, j)),
            pl.BlockSpec((tm, tn), lambda i, j, k: (i, j)),
        ),
        scratch_shapes=[pltpu.VMEM((tm, tn), jnp.float32)],
        compiler_params=pltpu.CompilerParams(
            dimension_semantics=("parallel", "parallel", "arbitrary")),
    )(a_p, b_p, bias_p)
    return pre, post


# ----------------------------------------------------------------------------------
# Fused gram + style-SSD kernel: gram = (g^T g) / HW ; ssd = sum((gram - ref)^2)
# ----------------------------------------------------------------------------------

def _gram_ssd_kernel(g_ref, ref_ref, gram_ref, ssd_ref, acc_ref, *, inv_hw):
    @pl.when(pl.program_id(0) == 0)
    def _init():
        acc_ref[...] = jnp.zeros_like(acc_ref)

    f = g_ref[...]
    # Contraction over the spatial (row) axis of the (H*W, N*Cp) slab without any HBM
    # transpose copy: in-kernel transpose feeds the MXU directly.
    acc_ref[...] += jnp.dot(f.T, f, preferred_element_type=jnp.float32)

    @pl.when(pl.program_id(0) == pl.num_programs(0) - 1)
    def _fin():
        gm = acc_ref[...] * inv_hw
        gram_ref[...] = gm
        d = gm - ref_ref[...]
        ssd_ref[...] = jnp.sum(d * d, keepdims=True)


def pallas_gram_ssd(g, ref_gram, hw_real):
    """g: (H*W, N*Cp) feature slab; ref_gram: (N*Cp, N*Cp). Returns (gram, ssd_scalar)."""
    M, NC = g.shape
    rt = min(512, _round_up(M, 128))
    Mp = _round_up(M, rt)
    if Mp != M:
        g = jnp.pad(g, ((0, Mp - M), (0, 0)))   # zero rows contribute 0 to the gram
    gram, ssd = pl.pallas_call(
        functools.partial(_gram_ssd_kernel, inv_hw=1.0 / float(hw_real)),
        out_shape=(jax.ShapeDtypeStruct((NC, NC), jnp.float32),
                   jax.ShapeDtypeStruct((1, 1), jnp.float32)),
        grid=(Mp // rt,),
        in_specs=[
            pl.BlockSpec((rt, NC), lambda k: (k, 0)),
            pl.BlockSpec((NC, NC), lambda k: (0, 0)),
        ],
        out_specs=(
            pl.BlockSpec((NC, NC), lambda k: (0, 0)),
            pl.BlockSpec((1, 1), lambda k: (0, 0)),
        ),
        scratch_shapes=[pltpu.VMEM((NC, NC), jnp.float32)],
        compiler_params=pltpu.CompilerParams(dimension_semantics=("arbitrary",)),
    )(g.astype(jnp.float32), ref_gram.astype(jnp.float32))
    return gram, ssd[0, 0]


# ----------------------------------------------------------------------------------
# Lane-dense sum-of-squared-differences reduction (used for MSE / temporal loss)
# ----------------------------------------------------------------------------------

def _ssd_kernel(a_ref, b_ref, o_ref, acc_ref):
    @pl.when(pl.program_id(0) == 0)
    def _init():
        acc_ref[...] = jnp.zeros_like(acc_ref)

    d = a_ref[...] - b_ref[...]
    acc_ref[...] += jnp.sum(d * d, keepdims=True)

    @pl.when(pl.program_id(0) == pl.num_programs(0) - 1)
    def _fin():
        o_ref[...] = acc_ref[...]


def pallas_sum_sq_diff(a, b):
    a = a.reshape(-1).astype(jnp.float32)
    b = b.reshape(-1).astype(jnp.float32)
    n = a.shape[0]
    rows = -(-n // LANE)
    rt = min(512, _round_up(rows, 8))
    rows_p = _round_up(rows, rt)
    total = rows_p * LANE
    if total != n:
        a = jnp.pad(a, (0, total - n))
        b = jnp.pad(b, (0, total - n))
    a2 = a.reshape(rows_p, LANE)
    b2 = b.reshape(rows_p, LANE)
    out = pl.pallas_call(
        _ssd_kernel,
        out_shape=jax.ShapeDtypeStruct((1, 1), jnp.float32),
        grid=(rows_p // rt,),
        in_specs=[pl.BlockSpec((rt, LANE), lambda k: (k, 0)),
                  pl.BlockSpec((rt, LANE), lambda k: (k, 0))],
        out_specs=pl.BlockSpec((1, 1), lambda k: (0, 0)),
        scratch_shapes=[pltpu.VMEM((1, 1), jnp.float32)],
        compiler_params=pltpu.CompilerParams(dimension_semantics=("arbitrary",)),
    )(a2, b2)
    return out[0, 0]


# ----------------------------------------------------------------------------------
# Total-variation reduction on a lane-dense (N*C, H*W) slab
# ----------------------------------------------------------------------------------

def _tv_kernel(x_ref, o_ref, *, width, hw):
    x = x_ref[...]                                   # (Rp, H*W) lane-dense
    rows = x.shape[0]
    # diff along H:  img[h+1, w] - img[h, w]   (flat offset +width)
    dh = x[:, width:] - x[:, :-width]
    # diff along W:  img[h, w+1] - img[h, w], masked at image-row boundaries
    dwf = x[:, 1:] - x[:, :-1]
    col = jax.lax.broadcasted_iota(jnp.int32, (rows, hw - 1), 1)
    dw = jnp.where((col % width) < (width - 1), dwf, 0.0)
    o_ref[...] = jnp.sum(dh * dh, keepdims=True) + jnp.sum(dw * dw, keepdims=True)


def pallas_tv_sum(img_nchw):
    N, C, H, W = img_nchw.shape
    x = img_nchw.astype(jnp.float32).reshape(N * C, H * W)
    rows_p = _round_up(N * C, 8)
    if rows_p != N * C:
        x = jnp.pad(x, ((0, rows_p - N * C), (0, 0)))
    out = pl.pallas_call(
        functools.partial(_tv_kernel, width=W, hw=H * W),
        out_shape=jax.ShapeDtypeStruct((1, 1), jnp.float32),
    )(x)
    return out[0, 0]


# ----------------------------------------------------------------------------------
# Feature extractor (synthetic VGG-like stack), NHWC / channel-padded-to-128 layout
# ----------------------------------------------------------------------------------

def _im2col_3x3(x_nhwc, c_real):
    # TODO(synk): im2col is still materialized in HBM by XLA; folding the 9 taps into the
    # conv kernel's K grid axis would cut conv-input HBM traffic ~9x at real sizes.
    N, H, W, _ = x_nhwc.shape
    x = x_nhwc[..., :c_real]
    xp = jnp.pad(x, ((0, 0), (1, 1), (1, 1), (0, 0)))
    taps = [xp[:, kh:kh + H, kw:kw + W, :] for kh in range(3) for kw in range(3)]
    patches = jnp.concatenate(taps, axis=-1)          # (N, H, W, 9*Cin), (kh,kw,cin) order
    return patches.reshape(N * H * W, 9 * c_real)


def conv3x3_fused(x_nhwc, c_in, w, b):
    """3x3 conv, stride 1, pad 1, fused bias+ReLU; returns (pre, post, c_out) in padded NHWC."""
    N, H, W, _ = x_nhwc.shape
    cout = w.shape[0]
    patches = _im2col_3x3(x_nhwc, c_in)                            # (M, 9*Cin)
    wmat = jnp.transpose(w, (2, 3, 1, 0)).reshape(9 * c_in, cout)  # (kh,kw,cin) x cout
    pre, post = pallas_matmul_bias_relu(patches, wmat, b)
    M = N * H * W
    pre = pre[:M].reshape(N, H, W, -1)
    post = post[:M].reshape(N, H, W, -1)
    return pre, post, cout


def maxpool2x2_nhwc(x):
    N, H, W, C = x.shape
    return x.reshape(N, H // 2, 2, W // 2, 2, C).max(axis=(2, 4))


def init_feat_net(key):
    """Deterministic stand-in for vgg19.features: conv,relu,conv,relu,pool,conv,relu."""
    channels = [(3, 8), (8, 8), (8, 16)]
    kinds = ["conv", "relu", "conv", "relu", "pool", "conv", "relu"]
    layers = []
    ci = 0
    keys = jax.random.split(key, len(channels))
    for kind in kinds:
        if kind == "conv":
            cin, cout = channels[ci]
            w = 0.1 * jax.random.normal(keys[ci], (cout, cin, 3, 3), jnp.float32)
            bvec = jnp.zeros((cout,), jnp.float32)
            layers.append(("conv", w, bvec))
            ci += 1
        else:
            layers.append((kind,))
    return layers


def extract_features(x_nchw, net):
    """Returns list of (feature_nhwc_channel-padded-to-128, real_channel_count) per module."""
    feats = []
    h = jnp.transpose(x_nchw.astype(jnp.float32), (0, 2, 3, 1))   # NHWC once at the boundary
    c_real = h.shape[-1]
    i = 0
    while i < len(net):
        kind = net[i][0]
        if kind == "conv":
            _, w, b = net[i]
            pre, post, c_out = conv3x3_fused(h, c_real, w, b)
            feats.append((pre, c_out))                      # conv module output
            if i + 1 < len(net) and net[i + 1][0] == "relu":
                feats.append((post, c_out))                 # relu module output (fused)
                h, c_real = post, c_out
                i += 2
            else:
                h, c_real = pre, c_out
                i += 1
        elif kind == "relu":
            # Unreached for VGG-style nets (ReLU is always fused into the preceding conv).
            h = jnp.maximum(h, 0.0)
            feats.append((h, c_real))
            i += 1
        else:  # pool
            h = maxpool2x2_nhwc(h)
            feats.append((h, c_real))
            i += 1
    return feats


# ----------------------------------------------------------------------------------
# Loss pieces
# ----------------------------------------------------------------------------------

def _gram_slab(feat):
    arr, c_real = feat
    N, H, W, Cp = arr.shape
    g = arr.reshape(N, H * W, Cp)
    g = jnp.transpose(g, (1, 0, 2)).reshape(H * W, N * Cp)   # no-op for N=1
    return g, H * W, N, c_real, Cp


def compute_style_gram(feat):
    g, hw, N, _, Cp = _gram_slab(feat)
    ref = jnp.zeros((N * Cp, N * Cp), jnp.float32)
    gram, _ = pallas_gram_ssd(g, ref, hw)
    return gram                                              # channel-padded (N*Cp, N*Cp)


def content_loss(feat_a, feat_b):
    a, ca = feat_a
    b, _ = feat_b
    N, H, W, _ = a.shape
    # Padded channels are zero in both operands -> contribute 0; divide by REAL numel.
    return pallas_sum_sq_diff(a, b) / float(N * ca * H * W)


def style_loss(style_gram_padded, feat):
    g, hw, N, c_real, _ = _gram_slab(feat)
    _, ssd = pallas_gram_ssd(g, style_gram_padded, hw)       # ||G_style - G||^2 fused in-kernel
    return ssd / float((N * c_real) ** 2)                    # mse mean over REAL gram entries


def tv_reg(img, eta):
    total = pallas_tv_sum(img)
    return total ** (eta / 2.0)


def spatial_loss(feat_net, inp, out, gram_style, alpha, beta, gamma, c_layers, s_layers, eta):
    feats_in = extract_features(inp, feat_net)
    feats_out = extract_features(out, feat_net)
    content_acc = 0.0
    for l in c_layers:
        content_acc = content_acc + content_loss(feats_in[l], feats_out[l])
    style_acc = 0.0
    for i, l in enumerate(s_layers):
        style_acc = style_acc + style_loss(gram_style[i], feats_out[l])
    reg = tv_reg(out, eta)
    return alpha * content_acc + beta * style_acc + gamma * reg


def applyflow(original_hwc, flow):
    """Bilinear backward-warp (cv2.remap INTER_LINEAR, constant-0 border) in plain JAX."""
    # TODO(synk): data-dependent bilinear gather kept in plain JAX; no clean Pallas gather here.
    Hf, Wf, C = original_hwc.shape
    loc_y = jnp.broadcast_to(jnp.arange(Hf, dtype=jnp.float32)[:, None], (Hf, Wf))
    loc_x = jnp.broadcast_to(jnp.arange(Wf, dtype=jnp.float32)[None, :], (Hf, Wf))
    map_y = loc_y - flow[:, :, 1]
    map_x = loc_x - flow[:, :, 0]

    x0 = jnp.floor(map_x)
    y0 = jnp.floor(map_y)
    wx = map_x - x0
    wy = map_y - y0

    def sample(xi, yi):
        valid = (xi >= 0) & (xi < Wf) & (yi >= 0) & (yi < Hf)
        xc = jnp.clip(xi, 0, Wf - 1).astype(jnp.int32)
        yc = jnp.clip(yi, 0, Hf - 1).astype(jnp.int32)
        vals = original_hwc[yc, xc]
        return jnp.where(valid[..., None], vals, 0.0)

    v00 = sample(x0, y0)
    v01 = sample(x0 + 1, y0)
    v10 = sample(x0, y0 + 1)
    v11 = sample(x0 + 1, y0 + 1)
    return (v00 * ((1 - wx) * (1 - wy))[..., None]
            + v01 * (wx * (1 - wy))[..., None]
            + v10 * ((1 - wx) * wy)[..., None]
            + v11 * (wx * wy)[..., None])


def temporal_loss(frame_prev, frame, fwd_flow, bck_flow):
    if frame.ndim == 4:
        frame_prev = frame_prev[0]
        frame = frame[0]
    C, H, W = frame.shape
    # NOTE: the reference computes disocclusion / motion-boundary masks into `c`, but then
    # (bug in the reference) multiplies by the channel count `C` instead of `c`, so the masks
    # are dead code w.r.t. the returned value.  We reproduce the returned value.
    prev_hwc = jnp.transpose(frame_prev * 255.0, (1, 2, 0))
    warped = applyflow(prev_hwc, fwd_flow)
    predict = jnp.transpose(warped, (2, 0, 1)) / 255.0
    ssd = pallas_sum_sq_diff(frame, predict)                 # lane-dense Pallas reduction
    loss = (float(C) * ssd) / float(C * H * W)               # == sum / (H*W)
    return loss


# ----------------------------------------------------------------------------------
# HybridLoss module
# ----------------------------------------------------------------------------------

class HybridLoss:
    def __init__(self, style, lmbda, alpha, beta, gamma, c_layers, s_layers, eta, key):
        self.lmbda = lmbda
        self.alpha = alpha
        self.beta = beta
        self.gamma = gamma
        self.c_layers = list(c_layers)
        self.s_layers = list(s_layers)
        self.eta = eta
        self.feat_net = init_feat_net(key)
        feats_style = extract_features(style, self.feat_net)
        self.gram_style = [compute_style_gram(feats_style[l]) for l in self.s_layers]
        # Single jitted program: all Pallas calls + JAX glue compiled/fused together.
        self._forward_jit = jax.jit(self._forward)

    def _forward(self, inp, out, out_prev, fwd_flow, bwd_flow):
        sp = spatial_loss(self.feat_net, inp, out, self.gram_style,
                          self.alpha, self.beta, self.gamma,
                          self.c_layers, self.s_layers, self.eta)
        tem = temporal_loss(out_prev, out, fwd_flow, bwd_flow)
        total = sp + self.lmbda * tem
        return total, sp, tem

    def __call__(self, inp, out, inp_prev, out_prev, fwd_flow, bwd_flow):
        # inp_prev unused by the reference forward (only output_prev feeds temporal loss).
        return self._forward_jit(inp, out, out_prev, fwd_flow, bwd_flow)


# ----------------------------------------------------------------------------------
# Driver
# ----------------------------------------------------------------------------------

if __name__ == "__main__":
    key = jax.random.PRNGKey(0)
    ks = jax.random.split(key, 8)

    N, C, H, W = 1, 3, 16, 16
    style = jax.random.uniform(ks[0], (N, C, H, W), jnp.float32)
    inp = jax.random.uniform(ks[1], (N, C, H, W), jnp.float32)
    out = jax.random.uniform(ks[2], (N, C, H, W), jnp.float32)
    inp_prev = jax.random.uniform(ks[3], (N, C, H, W), jnp.float32)
    out_prev = jax.random.uniform(ks[4], (N, C, H, W), jnp.float32)
    fwd_flow = 2.0 * jax.random.normal(ks[5], (H, W, 2), jnp.float32)
    bwd_flow = 2.0 * jax.random.normal(ks[6], (H, W, 2), jnp.float32)

    loss_mod = HybridLoss(style, lmbda=10.0, alpha=1.0, beta=1e-2, gamma=1e-4,
                          c_layers=[3], s_layers=[1, 6], eta=2.0, key=ks[7])

    total, sp, tem = loss_mod(inp, out, inp_prev, out_prev, fwd_flow, bwd_flow)
    jax.block_until_ready(total)
    print("KERNEL_OK")
</pallas_src>

<mosaic_0001>
module attributes {stable_mosaic.version = 11 : i64} {
  func.func @_matmul_bias_relu_kernel(%arg0: i32, %arg1: i32, %arg2: i32, %arg3: memref<256x128xbf16, #tpu.memory_space<vmem>>, %arg4: memref<128x128xbf16, #tpu.memory_space<vmem>>, %arg5: memref<1x128xf32, #tpu.memory_space<vmem>>, %arg6: memref<256x128xf32, #tpu.memory_space<vmem>>, %arg7: memref<256x128xf32, #tpu.memory_space<vmem>>, %arg8: memref<256x128xf32, #tpu.memory_space<vmem>>) attributes {dimension_semantics = [#tpu.dimension_semantics<parallel>, #tpu.dimension_semantics<parallel>, #tpu.dimension_semantics<arbitrary>], iteration_bounds = array<i64: 1, 1, 1>, scalar_prefetch = 0 : i64, scratch_operands = 1 : i64, tpu.core_type = #tpu.core_type<tc>, window_params = [{transform_indices = @transform_0, window_bounds = array<i64: 256, 128>}, {transform_indices = @transform_1, window_bounds = array<i64: 128, 128>}, {transform_indices = @transform_2, window_bounds = array<i64: 1, 128>}, {transform_indices = @transform_3, window_bounds = array<i64: 256, 128>}, {transform_indices = @transform_4, window_bounds = array<i64: 256, 128>}]} {
    %c0_i32 = arith.constant 0 : i32
    %0 = arith.cmpi eq, %arg2, %c0_i32 : i32
    %1 = arith.extui %0 : i1 to i32
    %c0_i32_0 = arith.constant 0 : i32
    %2 = arith.cmpi ne, %1, %c0_i32_0 : i32
    scf.if %2 {
      %cst_10 = arith.constant 0.000000e+00 : f32
      %12 = vector.broadcast %cst_10 : f32 to vector<256x128xf32>
      %c0_11 = arith.constant 0 : index
      %c0_12 = arith.constant 0 : index
      %13 = vector.load %arg8[%c0_11, %c0_12] : memref<256x128xf32, #tpu.memory_space<vmem>>, vector<256x128xf32>
      tpu.vector_store %arg8[%c0_11, %c0_12], %12 {strides = array<i32>} : memref<256x128xf32, #tpu.memory_space<vmem>>, vector<256x128xf32>,
    } else {
    }
    %c0 = arith.constant 0 : index
    %c0_1 = arith.constant 0 : index
    %3 = vector.load %arg8[%c0, %c0_1] : memref<256x128xf32, #tpu.memory_space<vmem>>, vector<256x128xf32>
    %c0_2 = arith.constant 0 : index
    %c0_3 = arith.constant 0 : index
    %4 = vector.load %arg3[%c0_2, %c0_3] : memref<256x128xbf16, #tpu.memory_space<vmem>>, vector<256x128xbf16>
    %c0_4 = arith.constant 0 : index
    %c0_5 = arith.constant 0 : index
    %5 = vector.load %arg4[%c0_4, %c0_5] : memref<128x128xbf16, #tpu.memory_space<vmem>>, vector<128x128xbf16>
    %cst = arith.constant dense<0.000000e+00> : vector<256x128xf32>
    %6 = tpu.matmul %4, %5, %cst {dimension_numbers = #tpu.dot_dimension_numbers<[1], [0], [0], [1], [0, 0, 1, 1], [], []>} : vector<256x128xbf16>, vector<128x128xbf16>, vector<256x128xf32> -> vector<256x128xf32>
    %7 = arith.addf %3, %6 : vector<256x128xf32>
    %c0_6 = arith.constant 0 : index
    %c0_7 = arith.constant 0 : index
    %8 = vector.load %arg8[%c0_6, %c0_7] : memref<256x128xf32, #tpu.memory_space<vmem>>, vector<256x128xf32>
    tpu.vector_store %arg8[%c0_6, %c0_7], %7 {strides = array<i32>} : memref<256x128xf32, #tpu.memory_space<vmem>>, vector<256x128xf32>,
    %c0_i32_8 = arith.constant 0 : i32
    %9 = arith.cmpi eq, %arg2, %c0_i32_8 : i32
    %10 = arith.extui %9 : i1 to i32
    %c0_i32_9 = arith.constant 0 : i32
    %11 = arith.cmpi ne, %10, %c0_i32_9 : i32
    scf.if %11 {
      %c0_10 = arith.constant 0 : index
      %c0_11 = arith.constant 0 : index
      %12 = vector.load %arg8[%c0_10, %c0_11] : memref<256x128xf32, #tpu.memory_space<vmem>>, vector<256x128xf32>
      %c0_12 = arith.constant 0 : index
      %c0_13 = arith.constant 0 : index
      %13 = vector.load %arg5[%c0_12, %c0_13] : memref<1x128xf32, #tpu.memory_space<vmem>>, vector<1x128xf32>
      %14 = vector.broadcast %13 : vector<1x128xf32> to vector<256x128xf32>
      %15 = arith.addf %12, %14 : vector<256x128xf32>
      %c0_14 = arith.constant 0 : index
      %c0_15 = arith.constant 0 : index
      %16 = vector.load %arg6[%c0_14, %c0_15] : memref<256x128xf32, #tpu.memory_space<vmem>>, vector<256x128xf32>
      tpu.vector_store %arg6[%c0_14, %c0_15], %15 {strides = array<i32>} : memref<256x128xf32, #tpu.memory_space<vmem>>, vector<256x128xf32>,
      %cst_16 = arith.constant 0.000000e+00 : f32
      %17 = vector.broadcast %cst_16 : f32 to vector<256x128xf32>
      %18 = arith.maximumf %15, %17 : vector<256x128xf32>
      %c0_17 = arith.constant 0 : index
      %c0_18 = arith.constant 0 : index
      %19 = vector.load %arg7[%c0_17, %c0_18] : memref<256x128xf32, #tpu.memory_space<vmem>>, vector<256x128xf32>
      tpu.vector_store %arg7[%c0_17, %c0_18], %18 {strides = array<i32>} : memref<256x128xf32, #tpu.memory_space<vmem>>, vector<256x128xf32>,
    } else {
    }
    return
  }
  func.func @transform_0(%arg0: i32, %arg1: i32, %arg2: i32) -> (i32, i32) {
    %c0_i32 = arith.constant 0 : i32
    return %arg0, %arg2 : i32, i32
  }
  func.func @transform_1(%arg0: i32, %arg1: i32, %arg2: i32) -> (i32, i32) {
    %c0_i32 = arith.constant 0 : i32
    return %arg2, %arg1 : i32, i32
  }
  func.func @transform_2(%arg0: i32, %arg1: i32, %arg2: i32) -> (i32, i32) {
    %c0_i32 = arith.constant 0 : i32
    %c0_i32_0 = arith.constant 0 : i32
    return %c0_i32, %arg1 : i32, i32
  }
  func.func @transform_3(%arg0: i32, %arg1: i32, %arg2: i32) -> (i32, i32) {
    %c0_i32 = arith.constant 0 : i32
    return %arg0, %arg1 : i32, i32
  }
  func.func @transform_4(%arg0: i32, %arg1: i32, %arg2: i32) -> (i32, i32) {
    %c0_i32 = arith.constant 0 : i32
    return %arg0, %arg1 : i32, i32
  }
}

</mosaic_0001>

<bundles_post_ra>
// kernel: tpu_custom_call.1
= control target key start
LH: loop header
LB: loop body
LE: loop exit
PB: predicated region body
PF: predicated region fallthrough
CT: control target
= control target key end

     0   :  { %10 = vsyncpa [#allocation4], 0  ;;  %s1010_s0 = inlined_call_operand.hbm [shape: bf16[256,128], index: 0, kind: input, shape index: {}]   ;;  %s1011_s1 = inlined_call_operand.hbm [shape: bf16[128,128], index: 1, kind: input, shape index: {}]   ;;  %s1012_s2 = inlined_call_operand.vmem [shape: f32[1,128], index: 2, kind: input, shape index: {}]   ;;  %s1013_s3 = inlined_call_operand.hbm [shape: f32[256,128], index: 3, kind: output, shape index: {0}]   ;;  %s1014_s4 = inlined_call_operand.hbm [shape: f32[256,128], index: 4, kind: output, shape index: {1}]  }
   0x1   :  { %11 = vsyncpa [#allocation7], 0 }
   0x2   :  { %12 = vsyncpa [#allocation5], 0 }
   0x3   :  { %13 = vsyncpa [#allocation10], 0  ;;  %s18_s17 = sshll.u32 %s1010_s0, 4  ;;  %s925_s18 = smov [#allocation3]   ;;  %s19_s17 = int_to_ptr.hbm [resolvable:$true] %s18_s17 }
   0x4   :  { %s20_s19 = sshll.u32 %s925_s18, 4  ;;  %s31_s22 = sshll.u32 %s1011_s1, 4  ;;  %s21_s19 = int_to_ptr.vmem [resolvable:$true] %s20_s19  ;;  %s32_s22 = int_to_ptr.hbm [resolvable:$true] %s31_s22 }
   0x5   :  { %s926_s23 = smov 64   ;;  %s927_s24 = smov 4  }
   0x6   :  { %26 = dma.hbm_to_vmem [thread:$0]  %s19_s17, 2048, %s21_s19, [#allocation4], %s926_s23, %s926_s23, %s927_s24  }
   0x7   :  { %s928_s25 = smov [#allocation6]  }
   0x8   :  { %s33_s26 = sshll.u32 %s928_s25, 4  ;;  %s34_s26 = int_to_ptr.vmem [resolvable:$true] %s33_s26 }
   0x9   :  { %39 = dma.hbm_to_vmem [thread:$0]  %s32_s22, 1024, %s34_s26, [#allocation7], %s926_s23, %s926_s23, %s927_s24  }
   0xa   :  { %917 = dma.done.wait [#allocation4], 2048  }
   0xb   :  { %918 = vsyncadd [#allocation4], 4294965248 }
   0xc   :  { %919 = dma.done.wait [#allocation7], 1024  }
   0xd   :  { %920 = vsyncadd [#allocation7], 4294966272  ;;  %v787_v0 = vld [vmem:[#allocation6 + $0x38] sm:$0xff]  ;;  %v786_v1 = vld [vmem:[#allocation6 + $0x30] sm:$0xff]  ;;  %s636_s30 = sshll.u32 %s1013_s3, 4  ;;  %s930_s5 = smov [#allocation9]   ;;  %s637_s30 = int_to_ptr.hbm [resolvable:$true] %s636_s30 }
   0xe   :  { %310 = vmatpush.bf16.msra.mxu0 %v787_v0  ;;  %788 = vmatpush.bf16.msra.mxu1 %v787_v0  ;;  %v785_v2 = vld [vmem:[#allocation6 + $0x28] sm:$0xff]  ;;  %v784_v3 = vld [vmem:[#allocation6 + $0x20] sm:$0xff]  ;;  %v783_v4 = vld [vmem:[#allocation6 + $0x18] sm:$0xff]  ;;  %s647_s6 = sshll.u32 %s930_s5, 4  ;;  %s649_s9 = sshll.u32 %s1014_s4, 4  ;;  %s648_s6 = int_to_ptr.vmem [resolvable:$true] %s647_s6  ;;  %s650_s9 = int_to_ptr.hbm [resolvable:$true] %s649_s9 }
   0xf   :  { %789 = vmatpush.bf16.msra.mxu2 %v787_v0  ;;  %790 = vmatpush.bf16.msra.mxu3 %v787_v0  ;;  %v782_v5 = vld [vmem:[#allocation6 + $0x10] sm:$0xff]  ;;  %v781_v6 = vld [vmem:[#allocation6 + $0x8] sm:$0xff]  ;;  %v780_v7 = vld [vmem:[#allocation6] sm:$0xff]  ;;  %s931_s3 = smov 128   ;;  %s932_s10 = smov 8  }
  0x10   :  { %v764_v8 = vld [vmem:[#allocation3] sm:$0xff]  ;;  %v765_v12 = vld [vmem:[#allocation3 + $0x8] sm:$0xff]  ;;  %v766_v16 = vld [vmem:[#allocation3 + $0x10] sm:$0xff] }
  0x11   :  { %v768_v9 = vld [vmem:[#allocation3 + $0x20] sm:$0xff]  ;;  %v769_v13 = vld [vmem:[#allocation3 + $0x28] sm:$0xff]  ;;  %v770_v17 = vld [vmem:[#allocation3 + $0x30] sm:$0xff] }
  0x12   :  { %311 = vmatpush.bf16.msra.mxu0 %v786_v1  ;;  %791 = vmatpush.bf16.msra.mxu1 %v786_v1  ;;  %v772_v10 = vld [vmem:[#allocation3 + $0x40] sm:$0xff]  ;;  %v773_v14 = vld [vmem:[#allocation3 + $0x48] sm:$0xff]  ;;  %v774_v18 = vld [vmem:[#allocation3 + $0x50] sm:$0xff] }
  0x13   :  { %792 = vmatpush.bf16.msra.mxu2 %v786_v1  ;;  %793 = vmatpush.bf16.msra.mxu3 %v786_v1  ;;  %v776_v11 = vld [vmem:[#allocation3 + $0x60] sm:$0xff]  ;;  %v777_v15 = vld [vmem:[#allocation3 + $0x68] sm:$0xff]  ;;  %v778_v19 = vld [vmem:[#allocation3 + $0x70] sm:$0xff] }
  0x14   :  { %v767_v20 = vld [vmem:[#allocation3 + $0x18] sm:$0xff]  ;;  %v967_v24 = vld [vmem:[%s1012_s2] ss:$0 sm:$0xff]  ;;  %s929_s2 = smov [#allocation8]  }
  0x15   :  { %v771_v21 = vld [vmem:[#allocation3 + $0x38] sm:$0xff]  ;;  %s999_s27 = sshll.u32 %s929_s2, 4  ;;  %s635_s27 = int_to_ptr.vmem [resolvable:$true] %s999_s27 }
  0x16   :  { %312 = vmatpush.bf16.msra.mxu0 %v785_v2  ;;  %794 = vmatpush.bf16.msra.mxu1 %v785_v2  ;;  %v775_v22 = vld [vmem:[#allocation3 + $0x58] sm:$0xff] }
  0x17   :  { %795 = vmatpush.bf16.msra.mxu2 %v785_v2  ;;  %796 = vmatpush.bf16.msra.mxu3 %v785_v2  ;;  %v779_v23 = vld [vmem:[#allocation3 + $0x78] sm:$0xff] }
  0x1a   :  { %313 = vmatpush.bf16.msra.mxu0 %v784_v3  ;;  %797 = vmatpush.bf16.msra.mxu1 %v784_v3 }
  0x1b   :  { %798 = vmatpush.bf16.msra.mxu2 %v784_v3  ;;  %799 = vmatpush.bf16.msra.mxu3 %v784_v3 }
  0x1e   :  { %314 = vmatpush.bf16.msra.mxu0 %v783_v4  ;;  %800 = vmatpush.bf16.msra.mxu1 %v783_v4 }
  0x1f   :  { %801 = vmatpush.bf16.msra.mxu2 %v783_v4  ;;  %802 = vmatpush.bf16.msra.mxu3 %v783_v4 }
  0x22   :  { %315 = vmatpush.bf16.msra.mxu0 %v782_v5  ;;  %803 = vmatpush.bf16.msra.mxu1 %v782_v5 }
  0x23   :  { %804 = vmatpush.bf16.msra.mxu2 %v782_v5  ;;  %805 = vmatpush.bf16.msra.mxu3 %v782_v5 }
  0x26   :  { %316 = vmatpush.bf16.msra.mxu0 %v781_v6  ;;  %806 = vmatpush.bf16.msra.mxu1 %v781_v6 }
  0x27   :  { %807 = vmatpush.bf16.msra.mxu2 %v781_v6  ;;  %808 = vmatpush.bf16.msra.mxu3 %v781_v6 }
  0x2a   :  { %317 = vmatpush.bf16.msra.mxu0 %v780_v7  ;;  %809 = vmatpush.bf16.msra.mxu1 %v780_v7 }
  0x2b   :  { %810 = vmatpush.bf16.msra.mxu2 %v780_v7  ;;  %811 = vmatpush.bf16.msra.mxu3 %v780_v7 }
  0x2d   :  { %318 = vmatmul.bf16.vlgmr.msra.gmra.mxu0 %v764_v8  ;;  %338 = vmatmul.bf16.vlgmr.msra.gmra.mxu1 %v768_v9 }
  0x2e   :  { %358 = vmatmul.bf16.vlgmr.msra.gmra.mxu2 %v772_v10  ;;  %378 = vmatmul.bf16.vlgmr.msra.gmra.mxu3 %v776_v11 }
  0x3d   :  { %323 = vmatmul.bf16.gmra.mxu0 %v765_v12  ;;  %343 = vmatmul.bf16.gmra.mxu1 %v769_v13 }
  0x3e   :  { %363 = vmatmul.bf16.gmra.mxu2 %v773_v14  ;;  %383 = vmatmul.bf16.gmra.mxu3 %v777_v15 }
  0x4d   :  { %328 = vmatmul.bf16.gmra.mxu0 %v766_v16  ;;  %348 = vmatmul.bf16.gmra.mxu1 %v770_v17 }
  0x4e   :  { %368 = vmatmul.bf16.gmra.mxu2 %v774_v18  ;;  %388 = vmatmul.bf16.gmra.mxu3 %v778_v19 }
  0x5d   :  { %333 = vmatmul.bf16.gmra.mxu0 %v767_v20  ;;  %353 = vmatmul.bf16.gmra.mxu1 %v771_v21 }
  0x5e   :  { %373 = vmatmul.bf16.gmra.mxu2 %v775_v22  ;;  %393 = vmatmul.bf16.gmra.mxu3 %v779_v23 }
  0xaa   :  { %v319_v25 = vpop.f32.mrf.mxu0  ;;  %v339_v26 = vpop.f32.mrf.mxu1 }
  0xab   :  { %v502_v27 = vadd.f32 %v967_v24, %v319_v25  ;;  %v510_v28 = vadd.f32 %v967_v24, %v339_v26 }
  0xad   :  { %534 = vst [vmem:[#allocation8] sm:$0xff] %v502_v27  ;;  %v566_v29 = vmax.f32 %v502_v27, 0.0  ;;  %v574_v30 = vmax.f32 %v510_v28, 0.0 }
  0xae   :  { %542 = vst [vmem:[#allocation8 + $0x40] sm:$0xff] %v510_v28 }
  0xaf   :  { %598 = vst [vmem:[#allocation9] sm:$0xff] %v566_v29 }
  0xb0   :  { %606 = vst [vmem:[#allocation9 + $0x40] sm:$0xff] %v574_v30 }
  0xb1   :  { %v359_v31 = vpop.f32.mrf.mxu2  ;;  %v379_v32 = vpop.f32.mrf.mxu3 }
  0xb2   :  { %v518_v33 = vadd.f32 %v967_v24, %v359_v31  ;;  %v526_v34 = vadd.f32 %v967_v24, %v379_v32  ;;  %v321_v35 = vpop.f32.mrf.mxu0  ;;  %v341_v36 = vpop.f32.mrf.mxu1 }
  0xb3   :  { %v503_v37 = vadd.f32 %v967_v24, %v321_v35  ;;  %v511_v38 = vadd.f32 %v967_v24, %v341_v36 }
  0xb4   :  { %550 = vst [vmem:[#allocation8 + $0x80] sm:$0xff] %v518_v33  ;;  %v582_v39 = vmax.f32 %v518_v33, 0.0  ;;  %v590_v40 = vmax.f32 %v526_v34, 0.0 }
  0xb5   :  { %558 = vst [vmem:[#allocation8 + $0xc0] sm:$0xff] %v526_v34  ;;  %v567_v41 = vmax.f32 %v503_v37, 0.0  ;;  %v575_v42 = vmax.f32 %v511_v38, 0.0 }
  0xb6   :  { %614 = vst [vmem:[#allocation9 + $0x80] sm:$0xff] %v582_v39 }
  0xb7   :  { %622 = vst [vmem:[#allocation9 + $0xc0] sm:$0xff] %v590_v40 }
  0xb8   :  { %535 = vst [vmem:[#allocation8 + $0x8] sm:$0xff] %v503_v37 }
  0xb9   :  { %599 = vst [vmem:[#allocation9 + $0x8] sm:$0xff] %v567_v41  ;;  %v361_v43 = vpop.f32.mrf.mxu2  ;;  %v381_v44 = vpop.f32.mrf.mxu3 }
  0xba   :  { %543 = vst [vmem:[#allocation8 + $0x48] sm:$0xff] %v511_v38  ;;  %v519_v45 = vadd.f32 %v967_v24, %v361_v43  ;;  %v527_v46 = vadd.f32 %v967_v24, %v381_v44  ;;  %v324_v47 = vpop.f32.mrf.mxu0  ;;  %v344_v48 = vpop.f32.mrf.mxu1 }
  0xbb   :  { %607 = vst [vmem:[#allocation9 + $0x48] sm:$0xff] %v575_v42  ;;  %v504_v49 = vadd.f32 %v967_v24, %v324_v47  ;;  %v512_v50 = vadd.f32 %v967_v24, %v344_v48 }
  0xbc   :  { %551 = vst [vmem:[#allocation8 + $0x88] sm:$0xff] %v519_v45  ;;  %v583_v51 = vmax.f32 %v519_v45, 0.0  ;;  %v591_v52 = vmax.f32 %v527_v46, 0.0 }
  0xbd   :  { %559 = vst [vmem:[#allocation8 + $0xc8] sm:$0xff] %v527_v46  ;;  %v568_v53 = vmax.f32 %v504_v49, 0.0  ;;  %v576_v54 = vmax.f32 %v512_v50, 0.0 }
  0xbe   :  { %615 = vst [vmem:[#allocation9 + $0x88] sm:$0xff] %v583_v51 }
  0xbf   :  { %623 = vst [vmem:[#allocation9 + $0xc8] sm:$0xff] %v591_v52 }
  0xc0   :  { %536 = vst [vmem:[#allocation8 + $0x10] sm:$0xff] %v504_v49 }
  0xc1   :  { %600 = vst [vmem:[#allocation9 + $0x10] sm:$0xff] %v568_v53  ;;  %v364_v55 = vpop.f32.mrf.mxu2  ;;  %v384_v56 = vpop.f32.mrf.mxu3 }
  0xc2   :  { %544 = vst [vmem:[#allocation8 + $0x50] sm:$0xff] %v512_v50  ;;  %v520_v57 = vadd.f32 %v967_v24, %v364_v55  ;;  %v528_v58 = vadd.f32 %v967_v24, %v384_v56  ;;  %v326_v59 = vpop.f32.mrf.mxu0  ;;  %v346_v60 = vpop.f32.mrf.mxu1 }
  0xc3   :  { %608 = vst [vmem:[#allocation9 + $0x50] sm:$0xff] %v576_v54  ;;  %v505_v61 = vadd.f32 %v967_v24, %v326_v59  ;;  %v513_v62 = vadd.f32 %v967_v24, %v346_v60 }
  0xc4   :  { %552 = vst [vmem:[#allocation8 + $0x90] sm:$0xff] %v520_v57  ;;  %v584_v63 = vmax.f32 %v520_v57, 0.0  ;;  %v592_v0 = vmax.f32 %v528_v58, 0.0 }
  0xc5   :  { %560 = vst [vmem:[#allocation8 + $0xd0] sm:$0xff] %v528_v58  ;;  %v569_v1 = vmax.f32 %v505_v61, 0.0  ;;  %v577_v2 = vmax.f32 %v513_v62, 0.0 }
  0xc6   :  { %616 = vst [vmem:[#allocation9 + $0x90] sm:$0xff] %v584_v63 }
  0xc7   :  { %624 = vst [vmem:[#allocation9 + $0xd0] sm:$0xff] %v592_v0 }
  0xc8   :  { %537 = vst [vmem:[#allocation8 + $0x18] sm:$0xff] %v505_v61 }
  0xc9   :  { %601 = vst [vmem:[#allocation9 + $0x18] sm:$0xff] %v569_v1  ;;  %v366_v3 = vpop.f32.mrf.mxu2  ;;  %v386_v4 = vpop.f32.mrf.mxu3 }
  0xca   :  { %545 = vst [vmem:[#allocation8 + $0x58] sm:$0xff] %v513_v62  ;;  %v521_v5 = vadd.f32 %v967_v24, %v366_v3  ;;  %v529_v6 = vadd.f32 %v967_v24, %v386_v4  ;;  %v329_v7 = vpop.f32.mrf.mxu0  ;;  %v349_v8 = vpop.f32.mrf.mxu1 }
  0xcb   :  { %609 = vst [vmem:[#allocation9 + $0x58] sm:$0xff] %v577_v2  ;;  %v506_v9 = vadd.f32 %v967_v24, %v329_v7  ;;  %v514_v10 = vadd.f32 %v967_v24, %v349_v8 }
  0xcc   :  { %553 = vst [vmem:[#allocation8 + $0x98] sm:$0xff] %v521_v5  ;;  %v585_v11 = vmax.f32 %v521_v5, 0.0  ;;  %v593_v12 = vmax.f32 %v529_v6, 0.0 }
  0xcd   :  { %561 = vst [vmem:[#allocation8 + $0xd8] sm:$0xff] %v529_v6  ;;  %v570_v13 = vmax.f32 %v506_v9, 0.0  ;;  %v578_v14 = vmax.f32 %v514_v10, 0.0 }
  0xce   :  { %617 = vst [vmem:[#allocation9 + $0x98] sm:$0xff] %v585_v11 }
  0xcf   :  { %625 = vst [vmem:[#allocation9 + $0xd8] sm:$0xff] %v593_v12 }
  0xd0   :  { %538 = vst [vmem:[#allocation8 + $0x20] sm:$0xff] %v506_v9 }
  0xd1   :  { %602 = vst [vmem:[#allocation9 + $0x20] sm:$0xff] %v570_v13  ;;  %v369_v15 = vpop.f32.mrf.mxu2  ;;  %v389_v16 = vpop.f32.mrf.mxu3 }
  0xd2   :  { %546 = vst [vmem:[#allocation8 + $0x60] sm:$0xff] %v514_v10  ;;  %v522_v17 = vadd.f32 %v967_v24, %v369_v15  ;;  %v530_v18 = vadd.f32 %v967_v24, %v389_v16  ;;  %v331_v19 = vpop.f32.mrf.mxu0  ;;  %v351_v20 = vpop.f32.mrf.mxu1 }
  0xd3   :  { %610 = vst [vmem:[#allocation9 + $0x60] sm:$0xff] %v578_v14  ;;  %v507_v21 = vadd.f32 %v967_v24, %v331_v19  ;;  %v515_v22 = vadd.f32 %v967_v24, %v351_v20 }
  0xd4   :  { %554 = vst [vmem:[#allocation8 + $0xa0] sm:$0xff] %v522_v17  ;;  %v586_v23 = vmax.f32 %v522_v17, 0.0  ;;  %v594_v25 = vmax.f32 %v530_v18, 0.0 }
  0xd5   :  { %562 = vst [vmem:[#allocation8 + $0xe0] sm:$0xff] %v530_v18  ;;  %v571_v26 = vmax.f32 %v507_v21, 0.0  ;;  %v579_v27 = vmax.f32 %v515_v22, 0.0 }
  0xd6   :  { %618 = vst [vmem:[#allocation9 + $0xa0] sm:$0xff] %v586_v23 }
  0xd7   :  { %626 = vst [vmem:[#allocation9 + $0xe0] sm:$0xff] %v594_v25 }
  0xd8   :  { %539 = vst [vmem:[#allocation8 + $0x28] sm:$0xff] %v507_v21 }
  0xd9   :  { %603 = vst [vmem:[#allocation9 + $0x28] sm:$0xff] %v571_v26  ;;  %v371_v28 = vpop.f32.mrf.mxu2  ;;  %v391_v29 = vpop.f32.mrf.mxu3 }
  0xda   :  { %547 = vst [vmem:[#allocation8 + $0x68] sm:$0xff] %v515_v22  ;;  %v523_v30 = vadd.f32 %v967_v24, %v371_v28  ;;  %v531_v31 = vadd.f32 %v967_v24, %v391_v29  ;;  %v334_v32 = vpop.f32.mrf.mxu0  ;;  %v354_v33 = vpop.f32.mrf.mxu1 }
  0xdb   :  { %611 = vst [vmem:[#allocation9 + $0x68] sm:$0xff] %v579_v27  ;;  %v508_v34 = vadd.f32 %v967_v24, %v334_v32  ;;  %v516_v35 = vadd.f32 %v967_v24, %v354_v33 }
  0xdc   :  { %555 = vst [vmem:[#allocation8 + $0xa8] sm:$0xff] %v523_v30  ;;  %v587_v36 = vmax.f32 %v523_v30, 0.0  ;;  %v595_v37 = vmax.f32 %v531_v31, 0.0 }
  0xdd   :  { %563 = vst [vmem:[#allocation8 + $0xe8] sm:$0xff] %v531_v31  ;;  %v572_v38 = vmax.f32 %v508_v34, 0.0  ;;  %v580_v39 = vmax.f32 %v516_v35, 0.0 }
  0xde   :  { %619 = vst [vmem:[#allocation9 + $0xa8] sm:$0xff] %v587_v36 }
  0xdf   :  { %627 = vst [vmem:[#allocation9 + $0xe8] sm:$0xff] %v595_v37 }
  0xe0   :  { %540 = vst [vmem:[#allocation8 + $0x30] sm:$0xff] %v508_v34 }
  0xe1   :  { %604 = vst [vmem:[#allocation9 + $0x30] sm:$0xff] %v572_v38  ;;  %v374_v40 = vpop.f32.mrf.mxu2  ;;  %v394_v41 = vpop.f32.mrf.mxu3 }
  0xe2   :  { %548 = vst [vmem:[#allocation8 + $0x70] sm:$0xff] %v516_v35  ;;  %v524_v42 = vadd.f32 %v967_v24, %v374_v40  ;;  %v532_v43 = vadd.f32 %v967_v24, %v394_v41  ;;  %v336_v44 = vpop.f32.mrf.mxu0  ;;  %v356_v45 = vpop.f32.mrf.mxu1 }
  0xe3   :  { %612 = vst [vmem:[#allocation9 + $0x70] sm:$0xff] %v580_v39  ;;  %v509_v46 = vadd.f32 %v967_v24, %v336_v44  ;;  %v517_v47 = vadd.f32 %v967_v24, %v356_v45 }
  0xe4   :  { %556 = vst [vmem:[#allocation8 + $0xb0] sm:$0xff] %v524_v42  ;;  %v588_v48 = vmax.f32 %v524_v42, 0.0  ;;  %v596_v49 = vmax.f32 %v532_v43, 0.0 }
  0xe5   :  { %564 = vst [vmem:[#allocation8 + $0xf0] sm:$0xff] %v532_v43  ;;  %v573_v50 = vmax.f32 %v509_v46, 0.0  ;;  %v581_v51 = vmax.f32 %v517_v47, 0.0 }
  0xe6   :  { %620 = vst [vmem:[#allocation9 + $0xb0] sm:$0xff] %v588_v48 }
  0xe7   :  { %628 = vst [vmem:[#allocation9 + $0xf0] sm:$0xff] %v596_v49 }
  0xe8   :  { %541 = vst [vmem:[#allocation8 + $0x38] sm:$0xff] %v509_v46 }
  0xe9   :  { %605 = vst [vmem:[#allocation9 + $0x38] sm:$0xff] %v573_v50  ;;  %v376_v52 = vpop.f32.mrf.mxu2  ;;  %v396_v53 = vpop.f32.mrf.mxu3 }
  0xea   :  { %549 = vst [vmem:[#allocation8 + $0x78] sm:$0xff] %v517_v47  ;;  %v525_v54 = vadd.f32 %v967_v24, %v376_v52  ;;  %v533_v55 = vadd.f32 %v967_v24, %v396_v53 }
  0xeb   :  { %613 = vst [vmem:[#allocation9 + $0x78] sm:$0xff] %v581_v51 }
  0xec   :  { %557 = vst [vmem:[#allocation8 + $0xb8] sm:$0xff] %v525_v54  ;;  %v589_v56 = vmax.f32 %v525_v54, 0.0  ;;  %v597_v57 = vmax.f32 %v533_v55, 0.0 }
  0xed   :  { %565 = vst [vmem:[#allocation8 + $0xf8] sm:$0xff] %v533_v55 }
  0xee   :  { %621 = vst [vmem:[#allocation9 + $0xb8] sm:$0xff] %v589_v56  ;;  %642 = dma.vmem_to_hbm [thread:$0]  %s635_s27, 4096, %s637_s30, [#allocation5], %s931_s3, %s931_s3, %s932_s10  }
  0xef   :  { %629 = vst [vmem:[#allocation9 + $0xf8] sm:$0xff] %v597_v57 }
  0xf0   :  { %655 = dma.vmem_to_hbm [thread:$0]  %s648_s6, 4096, %s650_s9, [#allocation10], %s931_s3, %s931_s3, %s932_s10  }
  0xf1   :  { %921 = dma.done.wait [#allocation5], 4096  }
  0xf2   :  { %922 = vsyncadd [#allocation5], 4294963200 }
  0xf3   :  { %923 = dma.done.wait [#allocation10], 4096  }
  0xf4   :  { %924 = vsyncadd [#allocation10], 4294963200 }
  0xf5   :  { %664 = vsyncpa [#allocation4], 1 }
  0xf6   :  { %665 = vsyncpa [#allocation7], 1 }
  0xf7   :  { %666 = vsyncpa [#allocation5], 1 }
  0xf8   :  { %667 = vsyncpa [#allocation10], 1 }

</bundles_post_ra>
